<compile_context>
chip_gen: v7x
topology: tpu7x:2x2x1
jax: 0.10.0
libtpu: 0.0.40
codegen_flags: <defaults>
</compile_context>

<pallas_src>
import jax
import jax.numpy as jnp
from jax.experimental import pallas as pl
from jax.experimental.pallas import tpu as pltpu


# ---------------------------------------------------------------------------
# Path 1: fused-gather kernel (tables resident in VMEM, ids in SMEM).
# ---------------------------------------------------------------------------
def _make_fused_kernel(block_b, W, H):
    C = W - 1
    inv_c = 1.0 / C

    def kernel(ids_ref, in_emb_ref, out_emb_ref, o_ref, buf_ref):
        # ids_ref    : (B_pad*W,) int32 in SMEM (scalar prefetch)
        # in_emb_ref : (V, H) f32 in VMEM (whole table, DMA'd once)
        # out_emb_ref: (V, H) f32 in VMEM (whole table, DMA'd once)
        # o_ref      : (1, block_b) f32   per-row mean scores (lane-dense)
        # buf_ref    : (block_b, H) f32   scratch: t_row * sum_c(context_row)
        blk = pl.program_id(0)

        @pl.loop(0, block_b)
        def _(r):
            off = (blk * block_b + r) * W
            # Sum the C context embeddings for this row; never build (C,b,H).
            csum = jnp.zeros((1, H), jnp.float32)
            for k in range(C):                         # small static unroll
                cid = ids_ref[off + 1 + k]
                csum = csum + out_emb_ref[pl.ds(cid, 1), :].astype(jnp.float32)
            tid = ids_ref[off]
            t = in_emb_ref[pl.ds(tid, 1), :].astype(jnp.float32)
            buf_ref[pl.ds(r, 1), :] = t * csum

        # mean_c(t . c_c) == (t . sum_c c) / C ; lane-axis reduce over H.
        rowdot = jnp.sum(buf_ref[...], axis=-1) * inv_c        # (block_b,)
        o_ref[...] = rowdot[None, :]

    return kernel


# ---------------------------------------------------------------------------
# Path 2 (fallback): wrapper gathers + reduces context, kernel does row-dot.
# ---------------------------------------------------------------------------
def _rowdot_kernel(t_ref, c_ref, o_ref):
    # t_ref, c_ref: (block_b, H); c is already the context MEAN (1/C folded
    # into the XLA-fused gather+reduce).  o_ref: (1, block_b) lane-dense.
    prod = t_ref[...].astype(jnp.float32) * c_ref[...].astype(jnp.float32)
    o_ref[...] = jnp.sum(prod, axis=-1)[None, :]


def _round_up(v, m):
    return ((v + m - 1) // m) * m


def _choose_block_b(B):
    """Output-lane-dense batch tile.

    grid_b == 1 (block == full padded batch) for small B; otherwise a multiple
    of 128 so the output block is lane-dense (no masked partial stores) and
    grid_b >= 2 so the 'parallel' axis can use both v7x TensorCores.
    """
    if B <= 256:
        return _round_up(B, 8)
    blk = min(1024, ((B // 2) // 128) * 128)
    return max(128, blk)


def skipgram_forward(x, in_emb, out_emb, *, block_b=None, force_fallback=False):
    """x: int32 (B, W) token ids; column 0 = target, columns 1.. = context."""
    B, W = x.shape
    C = W - 1
    if C < 1:
        raise ValueError("Skipgram needs at least one context word (W >= 2).")
    V, H = in_emb.shape

    if block_b is None:
        block_b = _choose_block_b(B)
    block_b = max(8, _round_up(int(min(block_b, _round_up(B, 8))), 8))
    grid_b = -(-B // block_b)                        # ceil div
    if grid_b > 1 and block_b % 128 != 0:            # keep out block lane-dense
        block_b = _round_up(block_b, 128)
        grid_b = -(-B // block_b)
    B_pad = grid_b * block_b

    x = x.astype(jnp.int32)
    if B_pad != B:
        # Pad the (cheap) ids, never the gathered embeddings; 0 is a valid row.
        x = jnp.pad(x, ((0, B_pad - B), (0, 0)))

    itemsize = jnp.dtype(in_emb.dtype).itemsize
    table_bytes = 2 * V * H * itemsize               # both tables, raw
    # Keep (conservatively double-buffered) resident tables + scratch well
    # inside v7x's 64 MiB physical VMEM; otherwise fall back.
    use_fused = (not force_fallback) and (2 * table_bytes <= 40 * 1024 * 1024)

    if use_fused:
        kernel = _make_fused_kernel(block_b, W, H)
        vmem_need = 2 * table_bytes + block_b * max(H, 128) * 4 + block_b * 4
        cp = dict(dimension_semantics=("parallel",))
        if vmem_need > 16 * 1024 * 1024:             # v5e default scoped VMEM
            cp["vmem_limit_bytes"] = int(min(vmem_need + (8 << 20), 56 << 20))
        out = pl.pallas_call(
            kernel,
            out_shape=jax.ShapeDtypeStruct((1, B_pad), jnp.float32),
            grid_spec=pltpu.PrefetchScalarGridSpec(
                num_scalar_prefetch=1,
                grid=(grid_b,),
                in_specs=[
                    pl.BlockSpec((V, H), lambda i, ids: (0, 0)),
                    pl.BlockSpec((V, H), lambda i, ids: (0, 0)),
                ],
                out_specs=pl.BlockSpec((1, block_b), lambda i, ids: (0, i)),
                scratch_shapes=[pltpu.VMEM((block_b, H), jnp.float32)],
            ),
            compiler_params=pltpu.CompilerParams(**cp),
        )(x.reshape(-1), in_emb, out_emb)
        return out.reshape(B_pad)[:B]

    # Fallback: tables too large for VMEM.  Let XLA fuse the gather with the
    # context-mean reduction so only two (B_pad, H) arrays reach the kernel.
    target_e = jnp.take(in_emb, x[:, 0], axis=0)                       # (B_pad, H)
    context_m = jnp.mean(jnp.take(out_emb, x[:, 1:], axis=0), axis=1)  # (B_pad, H)
    # TODO(synk): for H < 128 a B-minor (H, B) layout would make vregs
    # lane-dense, but only pays off if the gather can emit it directly.
    out = pl.pallas_call(
        _rowdot_kernel,
        out_shape=jax.ShapeDtypeStruct((1, B_pad), jnp.float32),
        grid_spec=pltpu.PrefetchScalarGridSpec(
            num_scalar_prefetch=0,
            grid=(grid_b,),
            in_specs=[
                pl.BlockSpec((block_b, H), lambda i: (i, 0)),
                pl.BlockSpec((block_b, H), lambda i: (i, 0)),
            ],
            out_specs=pl.BlockSpec((1, block_b), lambda i: (0, i)),
        ),
        compiler_params=pltpu.CompilerParams(
            dimension_semantics=("parallel",)),
    )(target_e, context_m)
    return out.reshape(B_pad)[:B]


if __name__ == "__main__":
    vocab_size, hidden_size = 64, 32
    B, W = 8, 8                       # 1 target + 7 context words per row

    key = jax.random.PRNGKey(0)
    k_in, k_out, k_x = jax.random.split(key, 3)
    # Deterministic "parameters" matching nn.Embedding(vocab_size, hidden_size)
    in_emb = jax.random.normal(k_in, (vocab_size, hidden_size), jnp.float32)
    out_emb = jax.random.normal(k_out, (vocab_size, hidden_size), jnp.float32)
    x = jax.random.randint(k_x, (B, W), 0, vocab_size, dtype=jnp.int32)

    # Main (fused-gather) path.
    out = skipgram_forward(x, in_emb, out_emb)
    jax.block_until_ready(out)

    # f32 torch-equivalent reference (kernel is f32 end-to-end now; only fp
    # reassociation differs).
    t32 = in_emb[x[:, 0]]                                   # (B, H)
    c32 = out_emb[x[:, 1:]]                                 # (B, C, H)
    ref = jnp.mean(jnp.einsum("bh,bch->bc", t32, c32), axis=-1)
    assert out.shape == (B,)
    assert jnp.allclose(out, ref, atol=1e-4, rtol=1e-4)

    # Also exercise the large-vocab fallback path (streams (B,H) rows only).
    out_fb = skipgram_forward(x, in_emb, out_emb, force_fallback=True)
    jax.block_until_ready(out_fb)
    assert out_fb.shape == (B,)
    assert jnp.allclose(out_fb, ref, atol=1e-4, rtol=1e-4)

    print("KERNEL_OK")
</pallas_src>

<mosaic_0001>
module attributes {stable_mosaic.version = 11 : i64} {
  func.func @kernel(%arg0: i32, %arg1: memref<64xi32, #tpu.memory_space<smem>>, %arg2: memref<64x32xf32, #tpu.memory_space<vmem>>, %arg3: memref<64x32xf32, #tpu.memory_space<vmem>>, %arg4: memref<1x8xf32, #tpu.memory_space<vmem>>, %arg5: memref<8x32xf32, #tpu.memory_space<vmem>>) attributes {dimension_semantics = [#tpu.dimension_semantics<parallel>], iteration_bounds = array<i64: 1>, scalar_prefetch = 1 : i64, scratch_operands = 1 : i64, tpu.core_type = #tpu.core_type<tc>, window_params = [{pipeline_mode = #tpu.pipeline_mode<synchronous>, transform_indices = @transform_0, window_bounds = array<i64: 64, 32>}, {pipeline_mode = #tpu.pipeline_mode<synchronous>, transform_indices = @transform_1, window_bounds = array<i64: 64, 32>}, {transform_indices = @transform_2, window_bounds = array<i64: 1, 8>}]} {
    %c0_i32 = arith.constant 0 : i32
    %c8_i32 = arith.constant 8 : i32
    %0 = arith.addi %c0_i32, %c8_i32 : i32
    %c1_i32 = arith.constant 1 : i32
    scf.for %arg6 = %c0_i32 to %0 step %c1_i32  : i32 {
      %c1_i32_5 = arith.constant 1 : i32
      %7 = arith.muli %arg6, %c1_i32_5 : i32
      %c0_i32_6 = arith.constant 0 : i32
      %8 = arith.addi %c0_i32_6, %7 : i32
      %c8_i32_7 = arith.constant 8 : i32
      %9 = arith.muli %arg0, %c8_i32_7 : i32
      %10 = arith.addi %9, %8 : i32
      %c8_i32_8 = arith.constant 8 : i32
      %11 = arith.muli %10, %c8_i32_8 : i32
      %cst_9 = arith.constant 0.000000e+00 : f32
      %12 = vector.broadcast %cst_9 : f32 to vector<1x32xf32>
      %c1_i32_10 = arith.constant 1 : i32
      %13 = arith.addi %11, %c1_i32_10 : i32
      %c0_i32_11 = arith.constant 0 : i32
      %14 = arith.addi %13, %c0_i32_11 : i32
      %15 = arith.index_cast %14 : i32 to index
      %16 = memref.load %arg1[%15] : memref<64xi32, #tpu.memory_space<smem>>
      %17 = arith.index_cast %16 : i32 to index
      %c0_12 = arith.constant 0 : index
      %18 = vector.load %arg3[%17, %c0_12] : memref<64x32xf32, #tpu.memory_space<vmem>>, vector<1x32xf32>
      %19 = arith.addf %12, %18 : vector<1x32xf32>
      %c1_i32_13 = arith.constant 1 : i32
      %20 = arith.addi %11, %c1_i32_13 : i32
      %c1_i32_14 = arith.constant 1 : i32
      %21 = arith.addi %20, %c1_i32_14 : i32
      %22 = arith.index_cast %21 : i32 to index
      %23 = memref.load %arg1[%22] : memref<64xi32, #tpu.memory_space<smem>>
      %24 = arith.index_cast %23 : i32 to index
      %c0_15 = arith.constant 0 : index
      %25 = vector.load %arg3[%24, %c0_15] : memref<64x32xf32, #tpu.memory_space<vmem>>, vector<1x32xf32>
      %26 = arith.addf %19, %25 : vector<1x32xf32>
      %c1_i32_16 = arith.constant 1 : i32
      %27 = arith.addi %11, %c1_i32_16 : i32
      %c2_i32 = arith.constant 2 : i32
      %28 = arith.addi %27, %c2_i32 : i32
      %29 = arith.index_cast %28 : i32 to index
      %30 = memref.load %arg1[%29] : memref<64xi32, #tpu.memory_space<smem>>
      %31 = arith.index_cast %30 : i32 to index
      %c0_17 = arith.constant 0 : index
      %32 = vector.load %arg3[%31, %c0_17] : memref<64x32xf32, #tpu.memory_space<vmem>>, vector<1x32xf32>
      %33 = arith.addf %26, %32 : vector<1x32xf32>
      %c1_i32_18 = arith.constant 1 : i32
      %34 = arith.addi %11, %c1_i32_18 : i32
      %c3_i32 = arith.constant 3 : i32
      %35 = arith.addi %34, %c3_i32 : i32
      %36 = arith.index_cast %35 : i32 to index
      %37 = memref.load %arg1[%36] : memref<64xi32, #tpu.memory_space<smem>>
      %38 = arith.index_cast %37 : i32 to index
      %c0_19 = arith.constant 0 : index
      %39 = vector.load %arg3[%38, %c0_19] : memref<64x32xf32, #tpu.memory_space<vmem>>, vector<1x32xf32>
      %40 = arith.addf %33, %39 : vector<1x32xf32>
      %c1_i32_20 = arith.constant 1 : i32
      %41 = arith.addi %11, %c1_i32_20 : i32
      %c4_i32 = arith.constant 4 : i32
      %42 = arith.addi %41, %c4_i32 : i32
      %43 = arith.index_cast %42 : i32 to index
      %44 = memref.load %arg1[%43] : memref<64xi32, #tpu.memory_space<smem>>
      %45 = arith.index_cast %44 : i32 to index
      %c0_21 = arith.constant 0 : index
      %46 = vector.load %arg3[%45, %c0_21] : memref<64x32xf32, #tpu.memory_space<vmem>>, vector<1x32xf32>
      %47 = arith.addf %40, %46 : vector<1x32xf32>
      %c1_i32_22 = arith.constant 1 : i32
      %48 = arith.addi %11, %c1_i32_22 : i32
      %c5_i32 = arith.constant 5 : i32
      %49 = arith.addi %48, %c5_i32 : i32
      %50 = arith.index_cast %49 : i32 to index
      %51 = memref.load %arg1[%50] : memref<64xi32, #tpu.memory_space<smem>>
      %52 = arith.index_cast %51 : i32 to index
      %c0_23 = arith.constant 0 : index
      %53 = vector.load %arg3[%52, %c0_23] : memref<64x32xf32, #tpu.memory_space<vmem>>, vector<1x32xf32>
      %54 = arith.addf %47, %53 : vector<1x32xf32>
      %c1_i32_24 = arith.constant 1 : i32
      %55 = arith.addi %11, %c1_i32_24 : i32
      %c6_i32 = arith.constant 6 : i32
      %56 = arith.addi %55, %c6_i32 : i32
      %57 = arith.index_cast %56 : i32 to index
      %58 = memref.load %arg1[%57] : memref<64xi32, #tpu.memory_space<smem>>
      %59 = arith.index_cast %58 : i32 to index
      %c0_25 = arith.constant 0 : index
      %60 = vector.load %arg3[%59, %c0_25] : memref<64x32xf32, #tpu.memory_space<vmem>>, vector<1x32xf32>
      %61 = arith.addf %54, %60 : vector<1x32xf32>
      %62 = arith.index_cast %11 : i32 to index
      %63 = memref.load %arg1[%62] : memref<64xi32, #tpu.memory_space<smem>>
      %64 = arith.index_cast %63 : i32 to index
      %c0_26 = arith.constant 0 : index
      %65 = vector.load %arg2[%64, %c0_26] : memref<64x32xf32, #tpu.memory_space<vmem>>, vector<1x32xf32>
      %66 = arith.mulf %65, %61 : vector<1x32xf32>
      %67 = arith.index_cast %8 : i32 to index
      %c0_27 = arith.constant 0 : index
      %68 = vector.load %arg5[%67, %c0_27] : memref<8x32xf32, #tpu.memory_space<vmem>>, vector<1x32xf32>
      tpu.vector_store %arg5[%67, %c0_27], %66 {strides = array<i32>} : memref<8x32xf32, #tpu.memory_space<vmem>>, vector<1x32xf32>,
    }
    %c8_i32_0 = arith.constant 8 : i32
    %c0 = arith.constant 0 : index
    %c0_1 = arith.constant 0 : index
    %1 = vector.load %arg5[%c0, %c0_1] : memref<8x32xf32, #tpu.memory_space<vmem>>, vector<8x32xf32>
    %cst = arith.constant dense<0.000000e+00> : vector<8xf32>
    %2 = vector.multi_reduction <add>, %1, %cst [1] : vector<8x32xf32> to vector<8xf32>
    %cst_2 = arith.constant 0.142857149 : f32
    %3 = vector.broadcast %cst_2 : f32 to vector<8xf32>
    %4 = arith.mulf %2, %3 : vector<8xf32>
    %5 = vector.shape_cast %4 : vector<8xf32> to vector<1x8xf32>
    %c0_3 = arith.constant 0 : index
    %c0_4 = arith.constant 0 : index
    %6 = vector.load %arg4[%c0_3, %c0_4] : memref<1x8xf32, #tpu.memory_space<vmem>>, vector<1x8xf32>
    tpu.vector_store %arg4[%c0_3, %c0_4], %5 {strides = array<i32>} : memref<1x8xf32, #tpu.memory_space<vmem>>, vector<1x8xf32>,
    return
  }
  func.func @transform_0(%arg0: i32, %arg1: memref<64xi32, #tpu.memory_space<smem>>) -> (i32, i32) {
    %c0_i32 = arith.constant 0 : i32
    %c0_i32_0 = arith.constant 0 : i32
    %c0_i32_1 = arith.constant 0 : i32
    return %c0_i32, %c0_i32_0 : i32, i32
  }
  func.func @transform_1(%arg0: i32, %arg1: memref<64xi32, #tpu.memory_space<smem>>) -> (i32, i32) {
    %c0_i32 = arith.constant 0 : i32
    %c0_i32_0 = arith.constant 0 : i32
    %c0_i32_1 = arith.constant 0 : i32
    return %c0_i32, %c0_i32_0 : i32, i32
  }
  func.func @transform_2(%arg0: i32, %arg1: memref<64xi32, #tpu.memory_space<smem>>) -> (i32, i32) {
    %c0_i32 = arith.constant 0 : i32
    %c0_i32_0 = arith.constant 0 : i32
    return %c0_i32, %arg0 : i32, i32
  }
}

</mosaic_0001>

<bundles_post_ra>
// kernel: tpu_custom_call.1
= control target key start
LH: loop header
LB: loop body
LE: loop exit
PB: predicated region body
PF: predicated region fallthrough
CT: control target
= control target key end

     0   :  { %s242_s0 = inlined_call_operand.vmem [shape: s32[64], index: 0, kind: input, shape index: {}]   ;;  %s243_s1 = inlined_call_operand.vmem [shape: f32[64,32], index: 1, kind: input, shape index: {}]   ;;  %s244_s2 = inlined_call_operand.vmem [shape: f32[64,32], index: 2, kind: input, shape index: {}]   ;;  %s245_s3 = inlined_call_operand.hbm [shape: f32[1,8], index: 3, kind: output, shape index: {}]  }
   0x1   :  { %s8_s14 = sshll.u32 %s242_s0, 4  ;;  %s9_s14 = int_to_ptr.vmem [resolvable:$true] %s8_s14 }
   0x2   :  { %s125_s15 = scalar_lea.vmem %s9_s14, 16  ;;  %p130_p1 = scmp.lt.s32.totalorder %s9_s14, %s9_s14 }
   0x3   :  { %p126_p0 = scmp.ne.s32.totalorder %s9_s14, %s125_s15  ;;  %p131_p2 = scmp.lt.s32.totalorder %s125_s15, %s125_s15 }
   0x5   :  { %p132_p3 = por %p131_p2, %p130_p1 }
   0x7   :  { %p133_p4 = pnand %p132_p3, %p126_p0 }
   0x9   :  { %136 = shalt.err (!%p133_p4)  }
   0xa   :  { %s171_s16 = smov [#allocation4]  }
   0xb   :  { %11 = dma.vmem_to_smem %s9_s14, 16, %s171_s16, [#allocation3] }
   0xc   :  { %163 = dma.done.wait [#allocation3], 16 }
   0xd   :  { %164 = vsyncadd [#allocation3], 4294967280 }
   0xe   :  { %13 = sfence }
   0xf   :  { %14 = vsyncpa [#allocation6], 0  ;;  %s196_s17 = smov 0  }
  0x10 LB: > { %s114_s0 = sshll.u32 %s169_s17, 3  ;;  %vm68_vm0 = vcmask 253952   ;;  %s169_s17 = sphi %s196_s17, %s24_s17  }
  0x11   : > { %s28_s18 = sadd.s32 1, %s114_s0  ;;  %s33_s19 = sadd.s32 2, %s114_s0 }
  0x12   : > { %s29_s20 = sld [smem:[#allocation4 + %s28_s18]]  ;;  %s38_s22 = sadd.s32 3, %s114_s0 }
  0x13   : > { %s34_s21 = sld [smem:[#allocation4 + %s33_s19]]  ;;  %s43_s23 = sadd.s32 4, %s114_s0 }
  0x14   : > { %s39_s24 = sld [smem:[#allocation4 + %s38_s22]]  ;;  %s48_s26 = sadd.s32 5, %s114_s0 }
  0x15   : > { %s44_s25 = sld [smem:[#allocation4 + %s43_s23]]  ;;  %s53_s27 = sadd.s32 6, %s114_s0 }
  0x16   : > { %s49_s28 = sld [smem:[#allocation4 + %s48_s26]]  ;;  %s58_s30 = sadd.s32 7, %s114_s0 }
  0x17   : > { %s54_s29 = sld [smem:[#allocation4 + %s53_s27]] }
  0x18   : > { %s63_s4 = sld [smem:[#allocation4 + %s114_s0]]  ;;  %s30_s7 = scalar_lea.vmem %s244_s2, %s29_s20 }
  0x19   : > { %s35_s10 = scalar_lea.vmem %s244_s2, %s34_s21  ;;  %v31_v0 = vld [vmem:[%s30_s7] sm:$0x1]  ;;  %s59_s11 = sld [smem:[#allocation4 + %s58_s30]] }
  0x1a   : > { %v36_v1 = vld [vmem:[%s35_s10] sm:$0x1]  ;;  %s40_s14 = scalar_lea.vmem %s244_s2, %s39_s24 }
  0x1b   : > { %v37_v2 = vadd.f32 %v36_v1, %v31_v0  ;;  %s45_s0 = scalar_lea.vmem %s244_s2, %s44_s25  ;;  %v41_v3 = vld [vmem:[%s40_s14] sm:$0x1] }
  0x1c   : > { %v46_v4 = vld [vmem:[%s45_s0] sm:$0x1]  ;;  %s50_s20 = scalar_lea.vmem %s244_s2, %s49_s28  ;;  %s67_s28 = scalar_lea.vmem [#allocation2], %s169_s17 }
  0x1d   : > { %v42_v5 = vadd.f32 %v41_v3, %v37_v2  ;;  %s55_s23 = scalar_lea.vmem %s244_s2, %s54_s29  ;;  %v51_v6 = vld [vmem:[%s50_s20] sm:$0x1]  ;;  %s24_s17 = sadd.s32 1, %s169_s17  }
  0x1e   : > { %v56_v8 = vld [vmem:[%s55_s23] sm:$0x1]  ;;  %s64_s5 = scalar_lea.vmem %s243_s1, %s63_s4  ;;  %p21_p5 = scmp.ge.s32.totalorder %s24_s17, 8  }
  0x1f   : > { %v47_v7 = vadd.f32 %v46_v4, %v42_v5  ;;  %s60_s27 = scalar_lea.vmem %s244_s2, %s59_s11  ;;  %v65_v12 = vld [vmem:[%s64_s5] sm:$0x1]  ;;  %vm71_vm1 = vcmask (%p21_p5), 261120   ;;  %v77_v17 = vlaneseq (%p21_p5)  ;;  %s172_s29 = smov (%p21_p5), [#allocation5]   ;;  %vm84_vm2 = vcmask (%p21_p5), 57344  }
  0x20   : > { %v61_v10 = vld [vmem:[%s60_s27] sm:$0x1]  ;;  %s92_s4 = sshll.u32 (%p21_p5), %s172_s29, 4  ;;  %s93_s4 = int_to_ptr.vmem [resolvable:$true] %s92_s4 }
  0x21   : > { %v52_v9 = vadd.f32 %v51_v6, %v47_v7  ;;  %v78_v18 = vand.u32 (%p21_p5), 127, %v77_v17  ;;  %v80_v19 = vshrl.u32 (%p21_p5), %v77_v17, 7  ;;  %s137_s6 = scalar_lea.vmem (%p21_p5), %s93_s4, 16  ;;  %s141_s17 = scalar_lea.vmem (%p21_p5), %s93_s4, 32 }
  0x22   :  { %p138_p6 = scmp.ne.s32.totalorder (%p21_p5), %s93_s4, %s137_s6  ;;  %p142_p7 = scmp.lt.s32.totalorder (%p21_p5), %s93_s4, %s93_s4 }
  0x23   : > { %v57_v11 = vadd.f32 %v56_v8, %v52_v9  ;;  %23 = sbr.rel (!%p21_p5) target bundleno = 16 (0x10), region = 44  ;;  %v81_v20 = vsub.s32 (%p21_p5), %v78_v18, %v80_v19  ;;  %p143_p8 = scmp.lt.s32.totalorder (%p21_p5), %s141_s17, %s137_s6 }
  0x25   : > { %v62_v13 = vadd.f32 %v61_v10, %v57_v11  ;;  %p144_p9 = por (%p21_p5), %p143_p8, %p142_p7 }
  0x27   : > { %v66_v14 = vmul.f32 %v65_v12, %v62_v13  ;;  %p145_p10 = pnand (%p21_p5), %p144_p9, %p138_p6 }
  0x29   : > { %69 = vst.msk [vmem:[%s67_s28] sm:$0x1] %vm68_vm0, %v66_v14 }
  0x30   :  { %v70_v15 = vld [vmem:[#allocation2] sm:$0xff] }
  0x31   :  { %v72_v16 = vsel %vm71_vm1, %v70_v15, 0.0 }
  0x32   :  { %73 = vadd.xlane.f32.xlu0 %v72_v16 }
  0xbf   :  { %v74_v21 = vpop.xlane.xlu0 %73 }
  0xc0   :  { %v75_v22 = vmul.f32 0.14285715, %v74_v21 }
  0xc2   :  { %v82_v23 = vrot.slane %v75_v22, %v81_v20 }
  0xc4   :  { %85 = vst.msk [vmem:[#allocation5] sm:$0x1] %vm84_vm2, %v82_v23 }
  0xc5   :  { %148 = shalt.err (!%p145_p10)
}
  0xc6   :  { %s149_s7 = scalar_lea.hbm %s245_s3, 16 }
  0xc7   :  { %p150_p11 = scmp.ne.s32.totalorder %s245_s3, %s149_s7  ;;  %p153_p12 = scmp.lt.u32.totalorder %s149_s7, %s245_s3 }
  0xc9   :  { %p155_p13 = pnand %p153_p12, %p150_p11 }
  0xcb   :  { %158 = shalt.err (!%p155_p13)
}
  0xcc   :  { %95 = dma.vmem_to_hbm [thread:$0]  %s93_s4, 16, %s245_s3, [#allocation6]  }
  0xcd   :  { %165 = dma.done.wait [#allocation6], 16  }
  0xce   :  { %166 = vsyncadd [#allocation6], 4294967280 }
  0xcf   :  { %99 = vsyncpa [#allocation6], 1 }

</bundles_post_ra>
